<compile_context>
chip_gen: v7x
topology: tpu7x:2x2x1
jax: 0.10.0
libtpu: 0.0.40
codegen_flags: <defaults>
</compile_context>

<pallas_src>
import functools

import jax
import jax.numpy as jnp
from jax.experimental import pallas as pl
from jax.experimental.pallas import tpu as pltpu

_EPS = 1e-6  # matches torch.pairwise_distance default eps

# Budget for the (double-buffered) input tiles: 3 inputs x 2 pipeline buffers.
# 12 MiB keeps comfortable headroom inside a 32 MiB scoped VMEM limit on every
# generation (v5e/v6e 128 MiB physical, v7x 64 MiB physical).
_VMEM_INPUT_BUDGET_BYTES = 12 * 1024 * 1024
_VMEM_LIMIT_BYTES = 32 * 1024 * 1024
_MAX_TILE_N = 2048


def _pick_tile_n(n_rows, d, itemsize):
    """Largest row tile that fits the VMEM input budget, capped by the data."""
    per_row_bytes = 3 * 2 * d * itemsize  # 3 inputs x 2 pipeline buffers
    t = _VMEM_INPUT_BUDGET_BYTES // max(per_row_bytes, 1)
    t = min(int(t), _MAX_TILE_N)
    if t >= n_rows:
        return n_rows  # single full-extent block (always layout-legal)
    return max(8, (t // 8) * 8)  # multiple of 8 sublanes; ragged tail is masked


def _triplet_partial_kernel(a_ref, p_ref, n_ref, out_ref, *, margin, n_valid,
                            tile_n, needs_mask):
    """One grid step: per-tile partial sum of hinge losses (no cross-step dep)."""
    i = pl.program_id(0)

    a = a_ref[...].astype(jnp.float32)
    p = p_ref[...].astype(jnp.float32)
    n = n_ref[...].astype(jnp.float32)

    # torch.pairwise_distance: ||x1 - x2 + eps||_2 (eps added elementwise)
    d_ap = jnp.sqrt(jnp.sum((a - p + _EPS) ** 2, axis=-1, keepdims=True))
    d_an = jnp.sqrt(jnp.sum((a - n + _EPS) ** 2, axis=-1, keepdims=True))

    per_triplet = jnp.maximum(d_ap - d_an + margin, 0.0)  # (tile_n, 1)

    if needs_mask:
        # Rows past n_valid in the ragged last block contain unspecified data;
        # the hardware select drops whatever (even NaN) they produced.
        row = jax.lax.broadcasted_iota(jnp.int32, (tile_n, 1), 0) + i * tile_n
        per_triplet = jnp.where(row < n_valid, per_triplet, jnp.float32(0.0))

    out_ref[0, 0] = jnp.sum(per_triplet)


def triplet_loss_with_margin(anchor, positive, negative, *, margin=1.0,
                             tile_n=None):
    """anchor/positive/negative: (N, D) embeddings. Returns scalar f32 loss.

    Inputs may be bf16 (halves HBM traffic); accumulation is always f32.
    """
    N, D = anchor.shape
    itemsize = jnp.dtype(anchor.dtype).itemsize

    if tile_n is None:
        tile_n = _pick_tile_n(N, D, itemsize)
    else:
        tile_n = int(tile_n)
        tile_n = N if tile_n >= N else max(8, (tile_n // 8) * 8)

    num_tiles = pl.cdiv(N, tile_n)
    needs_mask = (N % tile_n) != 0

    emb_spec = pl.BlockSpec((tile_n, D), lambda i: (i, 0))
    kernel = functools.partial(
        _triplet_partial_kernel, margin=float(margin), n_valid=N,
        tile_n=tile_n, needs_mask=needs_mask,
    )

    partials = pl.pallas_call(
        kernel,
        out_shape=jax.ShapeDtypeStruct((num_tiles, 1), jnp.float32),
        grid_spec=pltpu.PrefetchScalarGridSpec(
            num_scalar_prefetch=0,
            grid=(num_tiles,),
            in_specs=[emb_spec, emb_spec, emb_spec],
            out_specs=pl.BlockSpec(
                (1, 1), lambda i: (i, 0), memory_space=pltpu.SMEM
            ),
        ),
        compiler_params=pltpu.CompilerParams(
            dimension_semantics=("parallel",),
            vmem_limit_bytes=_VMEM_LIMIT_BYTES,
        ),
    )(anchor, positive, negative)

    # Tiny epilogue in plain JAX: mean over the valid N, then nan_to_num.
    loss = jnp.sum(partials) / jnp.float32(N)
    return jnp.where(jnp.isnan(loss), jnp.float32(0.0), loss)


def _reference(anchor, positive, negative, margin=1.0):
    a = anchor.astype(jnp.float32)
    p = positive.astype(jnp.float32)
    n = negative.astype(jnp.float32)
    d_ap = jnp.sqrt(jnp.sum((a - p + _EPS) ** 2, axis=-1))
    d_an = jnp.sqrt(jnp.sum((a - n + _EPS) ** 2, axis=-1))
    loss = jnp.mean(jnp.maximum(d_ap - d_an + margin, 0.0))
    return jnp.nan_to_num(loss, nan=0.0)


if __name__ == "__main__":
    key = jax.random.PRNGKey(0)

    # Case 1: small demo shapes (8 triplets, 32-dim embeddings), single tile.
    N, D = 8, 32
    ka, kp, kn = jax.random.split(key, 3)
    anchor = jax.random.normal(ka, (N, D), dtype=jnp.float32)
    positive = jax.random.normal(kp, (N, D), dtype=jnp.float32)
    negative = jax.random.normal(kn, (N, D), dtype=jnp.float32)

    loss = triplet_loss_with_margin(anchor, positive, negative, margin=1.0)
    jax.block_until_ready(loss)
    ref = _reference(anchor, positive, negative, margin=1.0)
    assert jnp.allclose(loss, ref, atol=1e-5, rtol=1e-4), (loss, ref)

    # Case 2: non-divisible N with an explicit small tile to exercise the
    # multi-tile parallel grid + ragged last block + row masking path.
    N2, D2 = 300, 32
    k2a, k2p, k2n = jax.random.split(jax.random.PRNGKey(1), 3)
    a2 = jax.random.normal(k2a, (N2, D2), dtype=jnp.float32)
    p2 = jax.random.normal(k2p, (N2, D2), dtype=jnp.float32)
    n2 = jax.random.normal(k2n, (N2, D2), dtype=jnp.float32)

    loss2 = triplet_loss_with_margin(a2, p2, n2, margin=0.5, tile_n=64)
    jax.block_until_ready(loss2)
    ref2 = _reference(a2, p2, n2, margin=0.5)
    assert jnp.allclose(loss2, ref2, atol=1e-5, rtol=1e-4), (loss2, ref2)

    # Case 3: non-divisible N with auto tile -> single full-extent block.
    loss3 = triplet_loss_with_margin(a2, p2, n2, margin=1.0)
    jax.block_until_ready(loss3)
    ref3 = _reference(a2, p2, n2, margin=1.0)
    assert jnp.allclose(loss3, ref3, atol=1e-5, rtol=1e-4), (loss3, ref3)

    print("KERNEL_OK")
</pallas_src>

<mosaic_0001>
module attributes {stable_mosaic.version = 11 : i64} {
  func.func @_triplet_partial_kernel(%arg0: i32, %arg1: memref<8x32xf32, #tpu.memory_space<vmem>>, %arg2: memref<8x32xf32, #tpu.memory_space<vmem>>, %arg3: memref<8x32xf32, #tpu.memory_space<vmem>>, %arg4: memref<1x1xf32, #tpu.memory_space<smem>>) attributes {dimension_semantics = [#tpu.dimension_semantics<parallel>], iteration_bounds = array<i64: 1>, scalar_prefetch = 0 : i64, scratch_operands = 0 : i64, tpu.core_type = #tpu.core_type<tc>, window_params = [{transform_indices = @transform_0, window_bounds = array<i64: 8, 32>}, {transform_indices = @transform_1, window_bounds = array<i64: 8, 32>}, {transform_indices = @transform_2, window_bounds = array<i64: 8, 32>}, {transform_indices = @transform_3, window_bounds = array<i64: 1, 1>}]} {
    %c0 = arith.constant 0 : index
    %c0_0 = arith.constant 0 : index
    %0 = vector.load %arg1[%c0, %c0_0] : memref<8x32xf32, #tpu.memory_space<vmem>>, vector<8x32xf32>
    %c0_1 = arith.constant 0 : index
    %c0_2 = arith.constant 0 : index
    %1 = vector.load %arg2[%c0_1, %c0_2] : memref<8x32xf32, #tpu.memory_space<vmem>>, vector<8x32xf32>
    %c0_3 = arith.constant 0 : index
    %c0_4 = arith.constant 0 : index
    %2 = vector.load %arg3[%c0_3, %c0_4] : memref<8x32xf32, #tpu.memory_space<vmem>>, vector<8x32xf32>
    %3 = arith.subf %0, %1 : vector<8x32xf32>
    %cst = arith.constant 9.99999997E-7 : f32
    %4 = vector.broadcast %cst : f32 to vector<8x32xf32>
    %5 = arith.addf %3, %4 : vector<8x32xf32>
    %6 = arith.mulf %5, %5 : vector<8x32xf32>
    %cst_5 = arith.constant dense<0.000000e+00> : vector<8xf32>
    %7 = vector.multi_reduction <add>, %6, %cst_5 [1] : vector<8x32xf32> to vector<8xf32>
    %8 = vector.shape_cast %7 : vector<8xf32> to vector<8x1xf32>
    %9 = math.sqrt %8 : vector<8x1xf32>
    %10 = arith.subf %0, %2 : vector<8x32xf32>
    %cst_6 = arith.constant 9.99999997E-7 : f32
    %11 = vector.broadcast %cst_6 : f32 to vector<8x32xf32>
    %12 = arith.addf %10, %11 : vector<8x32xf32>
    %13 = arith.mulf %12, %12 : vector<8x32xf32>
    %cst_7 = arith.constant dense<0.000000e+00> : vector<8xf32>
    %14 = vector.multi_reduction <add>, %13, %cst_7 [1] : vector<8x32xf32> to vector<8xf32>
    %15 = vector.shape_cast %14 : vector<8xf32> to vector<8x1xf32>
    %16 = math.sqrt %15 : vector<8x1xf32>
    %17 = arith.subf %9, %16 : vector<8x1xf32>
    %cst_8 = arith.constant 1.000000e+00 : f32
    %18 = vector.broadcast %cst_8 : f32 to vector<8x1xf32>
    %19 = arith.addf %17, %18 : vector<8x1xf32>
    %cst_9 = arith.constant 0.000000e+00 : f32
    %20 = vector.broadcast %cst_9 : f32 to vector<8x1xf32>
    %21 = arith.maximumf %19, %20 : vector<8x1xf32>
    %22 = vector.shape_cast %21 : vector<8x1xf32> to vector<1x8x1xf32>
    %cst_10 = arith.constant dense<0.000000e+00> : vector<1xf32>
    %23 = vector.multi_reduction <add>, %22, %cst_10 [1, 2] : vector<1x8x1xf32> to vector<1xf32>
    %24 = vector.shape_cast %23 : vector<1xf32> to vector<1x1x1xf32>
    %25 = vector.extract %24[0, 0, 0] : f32 from vector<1x1x1xf32>
    %c0_11 = arith.constant 0 : index
    %c0_12 = arith.constant 0 : index
    %26 = memref.load %arg4[%c0_11, %c0_12] : memref<1x1xf32, #tpu.memory_space<smem>>
    memref.store %25, %arg4[%c0_11, %c0_12] : memref<1x1xf32, #tpu.memory_space<smem>>
    return
  }
  func.func @transform_0(%arg0: i32) -> (i32, i32) {
    %c0_i32 = arith.constant 0 : i32
    %c0_i32_0 = arith.constant 0 : i32
    return %arg0, %c0_i32 : i32, i32
  }
  func.func @transform_1(%arg0: i32) -> (i32, i32) {
    %c0_i32 = arith.constant 0 : i32
    %c0_i32_0 = arith.constant 0 : i32
    return %arg0, %c0_i32 : i32, i32
  }
  func.func @transform_2(%arg0: i32) -> (i32, i32) {
    %c0_i32 = arith.constant 0 : i32
    %c0_i32_0 = arith.constant 0 : i32
    return %arg0, %c0_i32 : i32, i32
  }
  func.func @transform_3(%arg0: i32) -> (i32, i32) {
    %c0_i32 = arith.constant 0 : i32
    %c0_i32_0 = arith.constant 0 : i32
    return %arg0, %c0_i32 : i32, i32
  }
}

</mosaic_0001>

<bundles_post_ra>
// kernel: tpu_custom_call.1
= control target key start
LH: loop header
LB: loop body
LE: loop exit
PB: predicated region body
PF: predicated region fallthrough
CT: control target
= control target key end

     0   :  { %8 = vsyncpa [#allocation3], 0  ;;  %s275_s0 = inlined_call_operand.hbm [shape: f32[8,32], index: 0, kind: input, shape index: {}]   ;;  %s276_s1 = inlined_call_operand.hbm [shape: f32[8,32], index: 1, kind: input, shape index: {}]   ;;  %s277_s2 = inlined_call_operand.hbm [shape: f32[8,32], index: 2, kind: input, shape index: {}]   ;;  %s278_s3 = inlined_call_operand.hbm [shape: f32[1,1], index: 3, kind: output, shape index: {}]  }
   0x1   :  { %9 = vsyncpa [#allocation6], 0 }
   0x2   :  { %10 = vsyncpa [#allocation4], 0  ;;  %s203_s12 = smov [#allocation5]   ;;  %s204_s14 = smov [#allocation2]  }
   0x3   :  { %s27_s13 = sshll.u32 %s203_s12, 4  ;;  %s17_s15 = sshll.u32 %s204_s14, 4  ;;  %s28_s13 = int_to_ptr.vmem [resolvable:$true] %s27_s13  ;;  %s18_s15 = int_to_ptr.vmem [resolvable:$true] %s17_s15 }
   0x4   :  { %s121_s18 = scalar_lea.hbm %s276_s1, 128 }
   0x5   :  { %p122_p0 = scmp.ne.s32.totalorder %s276_s1, %s121_s18  ;;  %p125_p1 = scmp.lt.u32.totalorder %s121_s18, %s276_s1 }
   0x7   :  { %p127_p2 = pnand %p125_p1, %p122_p0 }
   0x9   :  { %130 = shalt.err (!%p127_p2)
}
   0xa   :  { %s131_s23 = scalar_lea.vmem %s28_s13, 128  ;;  %p136_p4 = scmp.lt.s32.totalorder %s28_s13, %s28_s13 }
   0xb   :  { %p132_p3 = scmp.ne.s32.totalorder %s28_s13, %s131_s23  ;;  %p137_p5 = scmp.lt.s32.totalorder %s131_s23, %s131_s23 }
   0xd   :  { %p138_p6 = por %p137_p5, %p136_p4 }
   0xf   :  { %p139_p7 = pnand %p138_p6, %p132_p3 }
  0x11   :  { %142 = shalt.err (!%p139_p7)
}
  0x12   :  { %30 = dma.hbm_to_vmem [thread:$0]  %s276_s1, 128, %s28_s13, [#allocation6]  }
  0x13   :  { %s143_s28 = scalar_lea.hbm %s275_s0, 128 }
  0x14   :  { %p144_p8 = scmp.ne.s32.totalorder %s275_s0, %s143_s28  ;;  %p147_p9 = scmp.lt.u32.totalorder %s143_s28, %s275_s0 }
  0x16   :  { %p149_p10 = pnand %p147_p9, %p144_p8 }
  0x18   :  { %152 = shalt.err (!%p149_p10)
}
  0x19   :  { %s153_s6 = scalar_lea.vmem %s18_s15, 128  ;;  %p158_p12 = scmp.lt.s32.totalorder %s18_s15, %s18_s15 }
  0x1a   :  { %p154_p11 = scmp.ne.s32.totalorder %s18_s15, %s153_s6  ;;  %p159_p13 = scmp.lt.s32.totalorder %s153_s6, %s153_s6 }
  0x1c   :  { %p160_p0 = por %p159_p13, %p158_p12 }
  0x1e   :  { %p161_p1 = pnand %p160_p0, %p154_p11 }
  0x20   :  { %164 = shalt.err (!%p161_p1)
}
  0x21   :  { %20 = dma.hbm_to_vmem [thread:$0]  %s275_s0, 128, %s18_s15, [#allocation3]  }
  0x22   :  { %s205_s8 = smov [#allocation7]   ;;  %s165_s12 = scalar_lea.hbm %s277_s2, 128 }
  0x23   :  { %s37_s9 = sshll.u32 %s205_s8, 4  ;;  %p166_p2 = scmp.ne.s32.totalorder %s277_s2, %s165_s12  ;;  %s38_s9 = int_to_ptr.vmem [resolvable:$true] %s37_s9 }
  0x24   :  { %p169_p3 = scmp.lt.u32.totalorder %s165_s12, %s277_s2 }
  0x26   :  { %p171_p4 = pnand %p169_p3, %p166_p2 }
  0x28   :  { %174 = shalt.err (!%p171_p4)
}
  0x29   :  { %s175_s18 = scalar_lea.vmem %s38_s9, 128  ;;  %p180_p6 = scmp.lt.s32.totalorder %s38_s9, %s38_s9 }
  0x2a   :  { %p176_p5 = scmp.ne.s32.totalorder %s38_s9, %s175_s18  ;;  %p181_p7 = scmp.lt.s32.totalorder %s175_s18, %s175_s18 }
  0x2c   :  { %p182_p8 = por %p181_p7, %p180_p6 }
  0x2e   :  { %p183_p9 = pnand %p182_p8, %p176_p5 }
  0x30   :  { %186 = shalt.err (!%p183_p9)
}
  0x31   :  { %40 = dma.hbm_to_vmem [thread:$0]  %s277_s2, 128, %s38_s9, [#allocation6]  }
  0x32   :  { %197 = dma.done.wait [#allocation3], 128  }
  0x33   :  { %198 = vsyncadd [#allocation3], 4294967168 }
  0x34   :  { %199 = dma.done.wait [#allocation6], 256  }
  0x35   :  { %200 = vsyncadd [#allocation6], 4294967040  ;;  %v50_v0 = vld [vmem:[#allocation2] sm:$0xff]  ;;  %v51_v1 = vld [vmem:[#allocation5] sm:$0xff]  ;;  %vm56_vm0 = vcmask 261120   ;;  %vm83_vm5 = vcmask 7168  }
  0x36   :  { %v52_v2 = vld [vmem:[#allocation7] sm:$0xff]  ;;  %v53_v3 = vsub.f32 %v50_v0, %v51_v1  ;;  %s187_s21 = scalar_lea.hbm %s278_s3, 16 }
  0x37   :  { %v67_v4 = vsub.f32 %v50_v0, %v52_v2  ;;  %p188_p10 = scmp.ne.s32.totalorder %s278_s3, %s187_s21  ;;  %p191_p11 = scmp.lt.u32.totalorder %s187_s21, %s278_s3 }
  0x38   :  { %v54_v5 = vadd.f32 1e-06, %v53_v3 }
  0x39   :  { %v68_v6 = vadd.f32 1e-06, %v67_v4  ;;  %p193_p12 = pnand %p191_p11, %p188_p10 }
  0x3a   :  { %v55_v7 = vmul.f32 %v54_v5, %v54_v5 }
  0x3b   :  { %v69_v8 = vmul.f32 %v68_v6, %v68_v6 }
  0x3c   :  { %v57_v9 = vsel %vm56_vm0, %v55_v7, 0.0 }
  0x3d   :  { %58 = vadd.xlane.f32.xlu0 %v57_v9  ;;  %v70_v10 = vsel %vm56_vm0, %v69_v8, 0.0 }
  0x41   :  { %71 = vadd.xlane.f32.xlu0 %v70_v10 }
  0xca   :  { %v59_v11 = vpop.xlane.xlu0 %58 }
  0xcb   :  { %117 = vrsqrt.f32 %v59_v11  ;;  %vm62_vm1 = vcmp.eq.f32.partialorder %v59_v11, inf  ;;  %v65_v18 = vand.u32 2147483648, %v59_v11  ;;  %vm64_vm3 = vcmp.eq.f32.partialorder %v59_v11, 0.0 }
  0xce   :  { %v72_v12 = vpop.xlane.xlu0 %71 }
  0xcf   :  { %119 = vrsqrt.f32 %v72_v12  ;;  %vm75_vm2 = vcmp.eq.f32.partialorder %v72_v12, inf  ;;  %v78_v19 = vand.u32 2147483648, %v72_v12  ;;  %vm77_vm4 = vcmp.eq.f32.partialorder %v72_v12, 0.0 }
  0xd5   :  { %v118_v13 = vpop.eup %117 }
  0xd6   :  { %v61_v14 = vmul.f32 %v118_v13, %v59_v11 }
  0xd8   :  { %v63_v17 = vsel %vm62_vm1, %v59_v11, %v61_v14 }
  0xd9   :  { %v120_v15 = vpop.eup %119  ;;  %v66_v21 = vsel %vm64_vm3, %v65_v18, %v63_v17 }
  0xda   :  { %v74_v16 = vmul.f32 %v120_v15, %v72_v12 }
  0xdc   :  { %v76_v20 = vsel %vm75_vm2, %v72_v12, %v74_v16 }
  0xdd   :  { %v79_v22 = vsel %vm77_vm4, %v78_v19, %v76_v20 }
  0xde   :  { %v80_v23 = vsub.f32 %v66_v21, %v79_v22 }
  0xe0   :  { %v81_v24 = vadd.f32 1.0, %v80_v23 }
  0xe2   :  { %v82_v25 = vmax.f32 %v81_v24, 0.0 }
  0xe4   :  { %v84_v26 = vsel %vm83_vm5, %v82_v25, 0.0 }
  0xe5   :  { %85 = vadd.xlane.f32.xlu1 %v84_v26 }
 0x172   :  { %v86_v27 = vpop.xlane.xlu1 %85 }
 0x173   :  { %v87_v28 = vrot.slane %v86_v27, 4 }
 0x175   :  { %v88_v29 = vadd.f32 %v87_v28, %v86_v27 }
 0x177   :  { %v89_v30 = vrot.slane %v88_v29, 2 }
 0x179   :  { %v90_v31 = vadd.f32 %v89_v30, %v88_v29 }
 0x17b   :  { %v91_v32 = vrot.slane %v90_v31, 1 }
 0x17d   :  { %v92_v33 = vadd.f32 %v91_v32, %v90_v31 }
 0x17f   :  { %111 = vpush %v92_v33 }
 0x1b0   :  { %s112_s2 = spop %111 }
 0x1b1   :  { %95 = sst [smem:[#allocation8]] %s112_s2 }
 0x1b2   :  { %196 = shalt.err (!%p193_p12)
}
 0x1b3   :  { %s206_s26 = smov [#allocation8]  }
 0x1b4   :  { %103 = dma.smem_to_hbm %s206_s26, 16, %s278_s3, [#allocation4]  }
 0x1b5   :  { %201 = dma.done.wait [#allocation4], 16  }
 0x1b6   :  { %202 = vsyncadd [#allocation4], 4294967280 }
 0x1b7   :  { %107 = sfence }
 0x1b8   :  { %108 = vsyncpa [#allocation3], 1 }
 0x1b9   :  { %109 = vsyncpa [#allocation6], 1 }
 0x1ba   :  { %110 = vsyncpa [#allocation4], 1 }

</bundles_post_ra>
